<compile_context>
chip_gen: v6e
topology: v6e:2x2x1
jax: 0.10.0
libtpu: 0.0.40
codegen_flags: <defaults>
</compile_context>

<pallas_src>
import functools

import jax
import jax.numpy as jnp
from jax.experimental import pallas as pl
from jax.experimental.pallas import tpu as pltpu

_LANE = 128
_SUBLANE = 8
_MAX_BLOCK_ROWS = 1024  # (1024,128) f32 = 512 KiB/stream/block; 10 streams x2 bufs ~ 10 MiB
_VMEM_LIMIT = 32 * 1024 * 1024  # explicit, safe on v5e/v6e/v7x


def _cdiv(a, b):
    return -(-a // b)


def _round_up(a, b):
    return _cdiv(a, b) * b


def _cascade(v, vth):
    """Multi-threshold spike cascade: returns (v_new, spike_total, spike_count).

    NOTE: threshold ordering (2.0, vth, 0.5, 0.25) matches the PyTorch
    reference; semantics implicitly assume 0.5 < v_threshold <= 2.0.
    """
    s2 = v > 2.0
    v = jnp.where(s2, v - 2.0, v)
    s1 = v > vth
    v = jnp.where(s1, v - vth, v)
    sh = v > 0.5
    v = jnp.where(sh, v - 0.5, v)
    shh = v > 0.25
    v = jnp.where(shh, v - 0.25, v)
    s2f = s2.astype(jnp.float32)
    s1f = s1.astype(jnp.float32)
    shf = sh.astype(jnp.float32)
    shhf = shh.astype(jnp.float32)
    spike = 2.0 * s2f + vth * s1f + 0.5 * shf + 0.25 * shhf
    count = s2f + s1f + shf + shhf
    return v, spike, count


def _mtn_kernel(dv_ref, v_ref, acc_ref, out_ref, cnt_ref, scal_ref,
                spike_ref, v_new_ref, acc_new_ref, out_new_ref, cnt_new_ref):
    """Steady-state eval update: state tensors already materialized."""
    vth = scal_ref[0]
    dv = dv_ref[...]
    v, spike, count = _cascade(v_ref[...] + dv, vth)
    spike_ref[...] = spike
    v_new_ref[...] = v
    acc_new_ref[...] = acc_ref[...] + dv
    out_new_ref[...] = out_ref[...] + spike
    cnt_new_ref[...] = cnt_ref[...] + count


def _mtn_first_kernel(dv_ref, scal_ref,
                      spike_ref, v_new_ref, acc_new_ref, out_new_ref,
                      cnt_new_ref):
    """First timestep: state is the scalar v_reset (no state reads from HBM)."""
    vth = scal_ref[0]
    v0 = scal_ref[1]  # v_reset
    dv = dv_ref[...]
    v, spike, count = _cascade(v0 + dv, vth)
    spike_ref[...] = spike
    v_new_ref[...] = v
    acc_new_ref[...] = v0 + dv
    out_new_ref[...] = v0 + spike
    cnt_new_ref[...] = v0 + count


def _layout(n_elems):
    """Pick (block_rows, m_rows) with minimal padding for n_elems f32 values."""
    rows = _cdiv(n_elems, _LANE)
    rows8 = _round_up(rows, _SUBLANE)
    n_blocks = _cdiv(rows8, _MAX_BLOCK_ROWS)
    block_rows = _round_up(_cdiv(rows8, n_blocks), _SUBLANE)  # <= _MAX_BLOCK_ROWS
    m_rows = n_blocks * block_rows
    return block_rows, m_rows


def _to_2d(dv, m_rows):
    flat = dv.astype(jnp.float32).reshape(-1)
    pad = m_rows * _LANE - flat.shape[0]
    if pad:
        flat = jnp.pad(flat, (0, pad))
    return flat.reshape(m_rows, _LANE)


def _pallas_step(dv2d, v2d, acc2d, out2d, cnt2d, scal, block_rows):
    m_rows = dv2d.shape[0]
    grid = (m_rows // block_rows,)
    blk = pl.BlockSpec((block_rows, _LANE), lambda i: (i, 0))
    smem = pl.BlockSpec(memory_space=pltpu.MemorySpace.SMEM)
    sds = jax.ShapeDtypeStruct((m_rows, _LANE), jnp.float32)
    return pl.pallas_call(
        _mtn_kernel,
        grid=grid,
        in_specs=[blk, blk, blk, blk, blk, smem],
        out_specs=(blk,) * 5,
        out_shape=(sds,) * 5,
        # state inputs (v, acc, out, cnt) update in place
        input_output_aliases={1: 1, 2: 2, 3: 3, 4: 4},
        compiler_params=pltpu.CompilerParams(
            dimension_semantics=("parallel",),
            vmem_limit_bytes=_VMEM_LIMIT),
    )(dv2d, v2d, acc2d, out2d, cnt2d, scal)


def _pallas_first(dv2d, scal, block_rows):
    m_rows = dv2d.shape[0]
    grid = (m_rows // block_rows,)
    blk = pl.BlockSpec((block_rows, _LANE), lambda i: (i, 0))
    smem = pl.BlockSpec(memory_space=pltpu.MemorySpace.SMEM)
    sds = jax.ShapeDtypeStruct((m_rows, _LANE), jnp.float32)
    return pl.pallas_call(
        _mtn_first_kernel,
        grid=grid,
        in_specs=[blk, smem],
        out_specs=(blk,) * 5,
        out_shape=(sds,) * 5,
        compiler_params=pltpu.CompilerParams(
            dimension_semantics=("parallel",),
            vmem_limit_bytes=_VMEM_LIMIT),
    )(dv2d, scal)


@functools.partial(
    jax.jit,
    static_argnames=("block_rows", "m_rows", "n_valid", "orig_shape"),
    donate_argnums=(1, 2, 3, 4))
def _step(dv, v2d, acc2d, out2d, cnt2d, scal, *,
          block_rows, m_rows, n_valid, orig_shape):
    dv2d = _to_2d(dv, m_rows)
    spike2d, v_n, acc_n, out_n, cnt_n = _pallas_step(
        dv2d, v2d, acc2d, out2d, cnt2d, scal, block_rows)
    spike = spike2d.reshape(-1)[:n_valid].reshape(orig_shape)
    return spike, v_n, acc_n, out_n, cnt_n


@functools.partial(
    jax.jit,
    static_argnames=("block_rows", "m_rows", "n_valid", "orig_shape"))
def _first_step(dv, scal, *, block_rows, m_rows, n_valid, orig_shape):
    dv2d = _to_2d(dv, m_rows)
    spike2d, v_n, acc_n, out_n, cnt_n = _pallas_first(dv2d, scal, block_rows)
    spike = spike2d.reshape(-1)[:n_valid].reshape(orig_shape)
    return spike, v_n, acc_n, out_n, cnt_n


class MultiThresholdNeuron:
    """JAX/Pallas port of Multi_Threshold_Neuron (eval mode)."""

    def __init__(self, v_threshold=1.0, v_reset=0.0):
        self.v_threshold = float(v_threshold)
        self.v_reset = float(v_reset)
        # [vth, v_reset] passed as an SMEM scalar array -> no recompiles when
        # the threshold value changes.
        self._scal = jnp.array([self.v_threshold, self.v_reset], jnp.float32)
        self.v = None
        self.acc_input = None
        self.output = None
        self.spikecount = None
        self._shape = None

    def reset(self):
        self.v = None
        self.acc_input = None
        self.output = None
        self.spikecount = None
        self._shape = None

    def __call__(self, dv):
        orig_shape = tuple(dv.shape)
        n = 1
        for d in orig_shape:
            n *= int(d)

        if self._shape is None:
            self._shape = orig_shape
        elif orig_shape != self._shape:
            raise ValueError(
                "input shape changed without reset(): got %r, state built for %r"
                % (orig_shape, self._shape))

        block_rows, m_rows = _layout(n)
        kw = dict(block_rows=block_rows, m_rows=m_rows,
                  n_valid=n, orig_shape=orig_shape)

        if self.v is None:
            spike, v_n, acc_n, out_n, cnt_n = _first_step(dv, self._scal, **kw)
        else:
            spike, v_n, acc_n, out_n, cnt_n = _step(
                dv, self.v, self.acc_input, self.output, self.spikecount,
                self._scal, **kw)

        # Persist state in the padded (m_rows, 128) layout. NOTE: pad-region
        # entries of these buffers are not meaningful.
        self.v = v_n
        self.acc_input = acc_n
        self.output = out_n
        self.spikecount = cnt_n
        return spike


def _reference(dv, v, acc, out, cnt, vth=1.0):
    """Pure-JAX reference of the eval-mode PyTorch forward."""
    v = v + dv
    s2 = v > 2.0
    v = jnp.where(s2, v - 2.0, v)
    s1 = v > vth
    v = jnp.where(s1, v - vth, v)
    sh = v > 0.5
    v = jnp.where(sh, v - 0.5, v)
    shh = v > 0.25
    v = jnp.where(shh, v - 0.25, v)
    spike = (2.0 * s2 + vth * s1 + 0.5 * sh + 0.25 * shh).astype(jnp.float32)
    return spike, v, acc + dv, out + spike, cnt + (
        s2.astype(jnp.float32) + s1 + sh + shh)


if __name__ == "__main__":
    key = jax.random.PRNGKey(0)
    N, C, H, W = 2, 4, 16, 16
    k1, k2 = jax.random.split(key)
    dv1 = jax.random.uniform(k1, (N, C, H, W), jnp.float32, -1.0, 4.0)
    dv2 = jax.random.uniform(k2, (N, C, H, W), jnp.float32, -1.0, 4.0)

    neuron = MultiThresholdNeuron(v_threshold=1.0, v_reset=0.0)

    spike1 = neuron(dv1)        # first step (scalar-reset fast path)
    spike2 = neuron(dv2)        # second step (stateful, aliased updates)
    jax.block_until_ready((spike1, spike2))

    # Reference check (two steps, stateful)
    z = jnp.zeros((N, C, H, W), jnp.float32)
    r_spike1, rv, racc, rout, rcnt = _reference(dv1, z, z, z, z)
    r_spike2, rv, racc, rout, rcnt = _reference(dv2, rv, racc, rout, rcnt)

    assert jnp.allclose(spike1, r_spike1, atol=1e-6), "step-1 mismatch"
    assert jnp.allclose(spike2, r_spike2, atol=1e-6), "step-2 mismatch"

    n_valid = rv.size
    assert jnp.allclose(
        neuron.v.reshape(-1)[:n_valid].reshape(rv.shape), rv, atol=1e-6), \
        "state v mismatch"
    assert jnp.allclose(
        neuron.spikecount.reshape(-1)[:n_valid].reshape(rcnt.shape),
        rcnt, atol=1e-6), "spikecount mismatch"
    assert jnp.allclose(
        neuron.output.reshape(-1)[:n_valid].reshape(rout.shape),
        rout, atol=1e-6), "output mismatch"
    assert jnp.allclose(
        neuron.acc_input.reshape(-1)[:n_valid].reshape(racc.shape),
        racc, atol=1e-6), "acc_input mismatch"

    print("KERNEL_OK")
</pallas_src>

<mosaic_0001>
module attributes {stable_mosaic.version = 11 : i64} {
  func.func @_mtn_first_kernel(%arg0: i32, %arg1: memref<16x128xf32, #tpu.memory_space<vmem>>, %arg2: memref<2xf32, #tpu.memory_space<smem>>, %arg3: memref<16x128xf32, #tpu.memory_space<vmem>>, %arg4: memref<16x128xf32, #tpu.memory_space<vmem>>, %arg5: memref<16x128xf32, #tpu.memory_space<vmem>>, %arg6: memref<16x128xf32, #tpu.memory_space<vmem>>, %arg7: memref<16x128xf32, #tpu.memory_space<vmem>>) attributes {dimension_semantics = [#tpu.dimension_semantics<parallel>], iteration_bounds = array<i64: 1>, scalar_prefetch = 0 : i64, scratch_operands = 0 : i64, tpu.core_type = #tpu.core_type<tc>, window_params = [{transform_indices = @transform_0, window_bounds = array<i64: 16, 128>}, {transform_indices = @transform_1, window_bounds = array<i64: 2>}, {transform_indices = @transform_2, window_bounds = array<i64: 16, 128>}, {transform_indices = @transform_3, window_bounds = array<i64: 16, 128>}, {transform_indices = @transform_4, window_bounds = array<i64: 16, 128>}, {transform_indices = @transform_5, window_bounds = array<i64: 16, 128>}, {transform_indices = @transform_6, window_bounds = array<i64: 16, 128>}]} {
    %c0 = arith.constant 0 : index
    %0 = memref.load %arg2[%c0] : memref<2xf32, #tpu.memory_space<smem>>
    %c1 = arith.constant 1 : index
    %1 = memref.load %arg2[%c1] : memref<2xf32, #tpu.memory_space<smem>>
    %c0_0 = arith.constant 0 : index
    %c0_1 = arith.constant 0 : index
    %2 = vector.load %arg1[%c0_0, %c0_1] : memref<16x128xf32, #tpu.memory_space<vmem>>, vector<16x128xf32>
    %3 = vector.broadcast %1 : f32 to vector<16x128xf32>
    %4 = arith.addf %3, %2 : vector<16x128xf32>
    %cst = arith.constant 2.000000e+00 : f32
    %5 = vector.broadcast %cst : f32 to vector<16x128xf32>
    %6 = arith.cmpf ogt, %4, %5 : vector<16x128xf32>
    %cst_2 = arith.constant 2.000000e+00 : f32
    %7 = vector.broadcast %cst_2 : f32 to vector<16x128xf32>
    %8 = arith.subf %4, %7 : vector<16x128xf32>
    %9 = arith.select %6, %8, %4 : vector<16x128xi1>, vector<16x128xf32>
    %10 = vector.broadcast %0 : f32 to vector<16x128xf32>
    %11 = arith.cmpf ogt, %9, %10 : vector<16x128xf32>
    %12 = vector.broadcast %0 : f32 to vector<16x128xf32>
    %13 = arith.subf %9, %12 : vector<16x128xf32>
    %14 = arith.select %11, %13, %9 : vector<16x128xi1>, vector<16x128xf32>
    %cst_3 = arith.constant 5.000000e-01 : f32
    %15 = vector.broadcast %cst_3 : f32 to vector<16x128xf32>
    %16 = arith.cmpf ogt, %14, %15 : vector<16x128xf32>
    %cst_4 = arith.constant 5.000000e-01 : f32
    %17 = vector.broadcast %cst_4 : f32 to vector<16x128xf32>
    %18 = arith.subf %14, %17 : vector<16x128xf32>
    %19 = arith.select %16, %18, %14 : vector<16x128xi1>, vector<16x128xf32>
    %cst_5 = arith.constant 2.500000e-01 : f32
    %20 = vector.broadcast %cst_5 : f32 to vector<16x128xf32>
    %21 = arith.cmpf ogt, %19, %20 : vector<16x128xf32>
    %cst_6 = arith.constant 2.500000e-01 : f32
    %22 = vector.broadcast %cst_6 : f32 to vector<16x128xf32>
    %23 = arith.subf %19, %22 : vector<16x128xf32>
    %24 = arith.select %21, %23, %19 : vector<16x128xi1>, vector<16x128xf32>
    %25 = arith.extui %6 : vector<16x128xi1> to vector<16x128xi32>
    %26 = arith.sitofp %25 : vector<16x128xi32> to vector<16x128xf32>
    %27 = arith.extui %11 : vector<16x128xi1> to vector<16x128xi32>
    %28 = arith.sitofp %27 : vector<16x128xi32> to vector<16x128xf32>
    %29 = arith.extui %16 : vector<16x128xi1> to vector<16x128xi32>
    %30 = arith.sitofp %29 : vector<16x128xi32> to vector<16x128xf32>
    %31 = arith.extui %21 : vector<16x128xi1> to vector<16x128xi32>
    %32 = arith.sitofp %31 : vector<16x128xi32> to vector<16x128xf32>
    %cst_7 = arith.constant 2.000000e+00 : f32
    %33 = vector.broadcast %cst_7 : f32 to vector<16x128xf32>
    %34 = arith.mulf %33, %26 : vector<16x128xf32>
    %35 = vector.broadcast %0 : f32 to vector<16x128xf32>
    %36 = arith.mulf %35, %28 : vector<16x128xf32>
    %37 = arith.addf %34, %36 : vector<16x128xf32>
    %cst_8 = arith.constant 5.000000e-01 : f32
    %38 = vector.broadcast %cst_8 : f32 to vector<16x128xf32>
    %39 = arith.mulf %38, %30 : vector<16x128xf32>
    %40 = arith.addf %37, %39 : vector<16x128xf32>
    %cst_9 = arith.constant 2.500000e-01 : f32
    %41 = vector.broadcast %cst_9 : f32 to vector<16x128xf32>
    %42 = arith.mulf %41, %32 : vector<16x128xf32>
    %43 = arith.addf %40, %42 : vector<16x128xf32>
    %44 = arith.addf %26, %28 : vector<16x128xf32>
    %45 = arith.addf %44, %30 : vector<16x128xf32>
    %46 = arith.addf %45, %32 : vector<16x128xf32>
    %c0_10 = arith.constant 0 : index
    %c0_11 = arith.constant 0 : index
    %47 = vector.load %arg3[%c0_10, %c0_11] : memref<16x128xf32, #tpu.memory_space<vmem>>, vector<16x128xf32>
    tpu.vector_store %arg3[%c0_10, %c0_11], %43 {strides = array<i32>} : memref<16x128xf32, #tpu.memory_space<vmem>>, vector<16x128xf32>,
    %c0_12 = arith.constant 0 : index
    %c0_13 = arith.constant 0 : index
    %48 = vector.load %arg4[%c0_12, %c0_13] : memref<16x128xf32, #tpu.memory_space<vmem>>, vector<16x128xf32>
    tpu.vector_store %arg4[%c0_12, %c0_13], %24 {strides = array<i32>} : memref<16x128xf32, #tpu.memory_space<vmem>>, vector<16x128xf32>,
    %49 = vector.broadcast %1 : f32 to vector<16x128xf32>
    %50 = arith.addf %49, %2 : vector<16x128xf32>
    %c0_14 = arith.constant 0 : index
    %c0_15 = arith.constant 0 : index
    %51 = vector.load %arg5[%c0_14, %c0_15] : memref<16x128xf32, #tpu.memory_space<vmem>>, vector<16x128xf32>
    tpu.vector_store %arg5[%c0_14, %c0_15], %50 {strides = array<i32>} : memref<16x128xf32, #tpu.memory_space<vmem>>, vector<16x128xf32>,
    %52 = vector.broadcast %1 : f32 to vector<16x128xf32>
    %53 = arith.addf %52, %43 : vector<16x128xf32>
    %c0_16 = arith.constant 0 : index
    %c0_17 = arith.constant 0 : index
    %54 = vector.load %arg6[%c0_16, %c0_17] : memref<16x128xf32, #tpu.memory_space<vmem>>, vector<16x128xf32>
    tpu.vector_store %arg6[%c0_16, %c0_17], %53 {strides = array<i32>} : memref<16x128xf32, #tpu.memory_space<vmem>>, vector<16x128xf32>,
    %55 = vector.broadcast %1 : f32 to vector<16x128xf32>
    %56 = arith.addf %55, %46 : vector<16x128xf32>
    %c0_18 = arith.constant 0 : index
    %c0_19 = arith.constant 0 : index
    %57 = vector.load %arg7[%c0_18, %c0_19] : memref<16x128xf32, #tpu.memory_space<vmem>>, vector<16x128xf32>
    tpu.vector_store %arg7[%c0_18, %c0_19], %56 {strides = array<i32>} : memref<16x128xf32, #tpu.memory_space<vmem>>, vector<16x128xf32>,
    return
  }
  func.func @transform_0(%arg0: i32) -> (i32, i32) {
    %c0_i32 = arith.constant 0 : i32
    %c0_i32_0 = arith.constant 0 : i32
    return %arg0, %c0_i32 : i32, i32
  }
  func.func @transform_1(%arg0: i32) -> i32 {
    %c0_i32 = arith.constant 0 : i32
    %c0_i32_0 = arith.constant 0 : i32
    return %c0_i32 : i32
  }
  func.func @transform_2(%arg0: i32) -> (i32, i32) {
    %c0_i32 = arith.constant 0 : i32
    %c0_i32_0 = arith.constant 0 : i32
    return %arg0, %c0_i32 : i32, i32
  }
  func.func @transform_3(%arg0: i32) -> (i32, i32) {
    %c0_i32 = arith.constant 0 : i32
    %c0_i32_0 = arith.constant 0 : i32
    return %arg0, %c0_i32 : i32, i32
  }
  func.func @transform_4(%arg0: i32) -> (i32, i32) {
    %c0_i32 = arith.constant 0 : i32
    %c0_i32_0 = arith.constant 0 : i32
    return %arg0, %c0_i32 : i32, i32
  }
  func.func @transform_5(%arg0: i32) -> (i32, i32) {
    %c0_i32 = arith.constant 0 : i32
    %c0_i32_0 = arith.constant 0 : i32
    return %arg0, %c0_i32 : i32, i32
  }
  func.func @transform_6(%arg0: i32) -> (i32, i32) {
    %c0_i32 = arith.constant 0 : i32
    %c0_i32_0 = arith.constant 0 : i32
    return %arg0, %c0_i32 : i32, i32
  }
}

</mosaic_0001>

<bundles_post_ra>
// kernel: _first_step.1
= control target key start
LH: loop header
LB: loop body
LE: loop exit
PB: predicated region body
PF: predicated region fallthrough
CT: control target
= control target key end

     0   :  { %12 = vsyncpa [#allocation4], 0  ;;  %s399_s0 = inlined_call_operand.vmem [shape: f32[16,128], index: 0, kind: input, shape index: {}]   ;;  %s400_s1 = inlined_call_operand.vmem [shape: f32[2], index: 1, kind: input, shape index: {}]   ;;  %s401_s2 = inlined_call_operand.vmem [shape: f32[16,128], index: 2, kind: output, shape index: {0}]   ;;  %s402_s3 = inlined_call_operand.hbm [shape: f32[16,128], index: 3, kind: output, shape index: {1}]   ;;  %s403_s4 = inlined_call_operand.hbm [shape: f32[16,128], index: 4, kind: output, shape index: {2}]   ;;  %s404_s5 = inlined_call_operand.hbm [shape: f32[16,128], index: 5, kind: output, shape index: {3}]   ;;  %s405_s6 = inlined_call_operand.hbm [shape: f32[16,128], index: 6, kind: output, shape index: {4}]  }
   0x1   :  { %13 = vsyncpa [#allocation3], 0 }
   0x2   :  { %14 = vsyncpa [#allocation7], 0 }
   0x3   :  { %15 = vsyncpa [#allocation10], 0  ;;  %s24_s23 = sshll.u32 %s400_s1, 4  ;;  %s25_s23 = int_to_ptr.vmem [resolvable:$true] %s24_s23 }
   0x4   :  { %s205_s24 = scalar_lea.vmem %s25_s23, 16  ;;  %p210_p1 = scmp.lt.s32.totalorder %s25_s23, %s25_s23 }
   0x5   :  { %p206_p0 = scmp.ne.s32.totalorder %s25_s23, %s205_s24  ;;  %p211_p2 = scmp.lt.s32.totalorder %s205_s24, %s205_s24 }
   0x7   :  { %p212_p3 = por %p211_p2, %p210_p1 }
   0x9   :  { %p213_p4 = pnand %p212_p3, %p206_p0 }
   0xb   :  { %216 = shalt.err (!%p213_p4)
}
   0xc   :  { %s305_s25 = smov [#allocation2]  }
   0xd   :  { %27 = dma.vmem_to_smem %s25_s23, 16, %s305_s25, [#allocation4]  }
   0xe   :  { %297 = dma.done.wait [#allocation4], 16  }
   0xf   :  { %298 = vsyncadd [#allocation4], 4294967280 }
  0x10   :  { %31 = sfence }
  0x11   :  { %s182_s26 = sld [smem:[#allocation2 + $0x1]]  ;;  %v34_v0 = vld [vmem:[%s399_s0] sm:$0xff]  ;;  %v35_v1 = vld [vmem:[%s399_s0 + $0x8] sm:$0xff]  ;;  %s306_s7 = smov [#allocation6]   ;;  %v307_v8 = vmov 0.0  }
  0x12   :  { %s32_s27 = sld [smem:[#allocation2]]  ;;  %s133_s8 = sshll.u32 %s306_s7, 4  ;;  %s134_s8 = int_to_ptr.vmem [resolvable:$true] %s133_s8 }
  0x13   :  { %s217_s0 = scalar_lea.vmem %s134_s8, 256  ;;  %p222_p6 = scmp.lt.s32.totalorder %s134_s8, %s134_s8 }
  0x14   :  { %p218_p5 = scmp.ne.s32.totalorder %s134_s8, %s217_s0  ;;  %p223_p7 = scmp.lt.s32.totalorder %s217_s0, %s217_s0 }
  0x16   :  { %p224_p8 = por %p223_p7, %p222_p6 }
  0x17   :  { %v357_v2 = vstv %s182_s26 }
  0x18   :  { %v37_v3 = vadd.f32 %v357_v2, %v34_v0  ;;  %v38_v4 = vadd.f32 %v357_v2, %v35_v1  ;;  %v45_v5 = vstv %s32_s27  ;;  %p225_p9 = pnand %p224_p8, %p218_p5 }
  0x1a   :  { %104 = vst [vmem:[#allocation6] sm:$0xff] %v37_v3  ;;  %105 = vst [vmem:[#allocation6 + $0x8] sm:$0xff] %v38_v4  ;;  %vm39_vm0 = vcmp.gt.f32.partialorder %v37_v3, 2.0  ;;  %v183_v6 = vadd.f32 -2.0, %v37_v3  ;;  %vm40_vm1 = vcmp.gt.f32.partialorder %v38_v4, 2.0  ;;  %v184_v7 = vadd.f32 -2.0, %v38_v4 }
  0x1b   :  { %v189_v9 = vsel %vm39_vm0, 1.0, %v307_v8  ;;  %v190_v10 = vsel %vm40_vm1, 1.0, %v307_v8 }
  0x1c   :  { %228 = shalt.err (!%p225_p9)
}
  0x1d   :  { %s308_s9 = smov 128   ;;  %s309_s10 = smov 8   ;;  %v43_v11 = vsel %vm39_vm0, %v183_v6, %v37_v3  ;;  %v44_v12 = vsel %vm40_vm1, %v184_v7, %v38_v4  ;;  %v80_v13 = vmul.f32 2.0, %v189_v9  ;;  %v81_v14 = vmul.f32 2.0, %v190_v10 }
  0x1e   :  { %139 = dma.vmem_to_hbm [thread:$0]  %s134_s8, 256, %s403_s4, [#allocation7], %s308_s9, %s308_s9, %s309_s10   ;;  %vm46_vm2 = vcmp.gt.f32.partialorder %v43_v11, %v45_v5  ;;  %v48_v15 = vsub.f32 %v43_v11, %v45_v5  ;;  %vm47_vm3 = vcmp.gt.f32.partialorder %v44_v12, %v45_v5  ;;  %v49_v16 = vsub.f32 %v44_v12, %v45_v5 }
  0x1f   :  { %v191_v17 = vsel %vm46_vm2, 1.0, %v307_v8  ;;  %v192_v18 = vsel %vm47_vm3, 1.0, %v307_v8  ;;  %s310_s4 = smov [#allocation5]   ;;  %s311_s14 = smov [#allocation8]  }
  0x20   :  { %v50_v19 = vsel %vm46_vm2, %v48_v15, %v43_v11  ;;  %v51_v20 = vsel %vm47_vm3, %v49_v16, %v44_v12  ;;  %v82_v21 = vmul.f32 %v191_v17, %v45_v5  ;;  %v83_v22 = vmul.f32 %v192_v18, %v45_v5  ;;  %s121_s13 = sshll.u32 %s310_s4, 4  ;;  %s145_s15 = sshll.u32 %s311_s14, 4  ;;  %s122_s13 = int_to_ptr.vmem [resolvable:$true] %s121_s13  ;;  %s146_s15 = int_to_ptr.vmem [resolvable:$true] %s145_s15 }
  0x21   :  { %vm52_vm4 = vcmp.gt.f32.partialorder %v50_v19, 0.5  ;;  %v185_v23 = vadd.f32 -0.5, %v50_v19  ;;  %vm53_vm5 = vcmp.gt.f32.partialorder %v51_v20, 0.5  ;;  %v186_v24 = vadd.f32 -0.5, %v51_v20  ;;  %s237_s16 = scalar_lea.vmem %s122_s13, 256  ;;  %p242_p11 = scmp.lt.s32.totalorder %s122_s13, %s122_s13 }
  0x22   :  { %v193_v25 = vsel %vm52_vm4, 1.0, %v307_v8  ;;  %v194_v26 = vsel %vm53_vm5, 1.0, %v307_v8  ;;  %v84_v27 = vadd.f32 %v82_v21, %v80_v13  ;;  %v85_v28 = vadd.f32 %v83_v22, %v81_v14  ;;  %p238_p10 = scmp.ne.s32.totalorder %s122_s13, %s237_s16  ;;  %p243_p12 = scmp.lt.s32.totalorder %s237_s16, %s237_s16 }
  0x23   :  { %v56_v29 = vsel %vm52_vm4, %v185_v23, %v50_v19  ;;  %v57_v30 = vsel %vm53_vm5, %v186_v24, %v51_v20  ;;  %v86_v31 = vmul.f32 0.5, %v193_v25  ;;  %v87_v32 = vmul.f32 0.5, %v194_v26 }
  0x24   :  { %vm58_vm6 = vcmp.gt.f32.partialorder %v56_v29, 0.25  ;;  %v187_v33 = vadd.f32 -0.25, %v56_v29  ;;  %vm59_vm7 = vcmp.gt.f32.partialorder %v57_v30, 0.25  ;;  %v188_v34 = vadd.f32 -0.25, %v57_v30  ;;  %p244_p13 = por %p243_p12, %p242_p11 }
  0x25   :  { %v195_v35 = vsel %vm58_vm6, 1.0, %v307_v8  ;;  %v196_v36 = vsel %vm59_vm7, 1.0, %v307_v8  ;;  %v88_v37 = vadd.f32 %v86_v31, %v84_v27  ;;  %v89_v38 = vadd.f32 %v87_v32, %v85_v28 }
  0x26   :  { %v62_v39 = vsel %vm58_vm6, %v187_v33, %v56_v29  ;;  %v63_v40 = vsel %vm59_vm7, %v188_v34, %v57_v30  ;;  %v90_v41 = vmul.f32 0.25, %v195_v35  ;;  %v91_v42 = vmul.f32 0.25, %v196_v36  ;;  %p245_p0 = pnand %p244_p13, %p238_p10 }
  0x27   :  { %102 = vst [vmem:[#allocation5] sm:$0xff] %v62_v39  ;;  %103 = vst [vmem:[#allocation5 + $0x8] sm:$0xff] %v63_v40  ;;  %v94_v43 = vadd.f32 %v191_v17, %v189_v9  ;;  %v95_v44 = vadd.f32 %v192_v18, %v190_v10 }
  0x28   :  { %v92_v45 = vadd.f32 %v90_v41, %v88_v37  ;;  %v93_v46 = vadd.f32 %v91_v42, %v89_v38 }
  0x29   :  { %248 = shalt.err (!%p245_p0)
}
  0x2a   :  { %127 = dma.vmem_to_hbm [thread:$0]  %s122_s13, 256, %s402_s3, [#allocation3], %s308_s9, %s308_s9, %s309_s10   ;;  %v96_v47 = vadd.f32 %v193_v25, %v94_v43  ;;  %v97_v48 = vadd.f32 %v194_v26, %v95_v44  ;;  %v106_v49 = vadd.f32 %v92_v45, %v357_v2  ;;  %v107_v50 = vadd.f32 %v93_v46, %v357_v2 }
  0x2b   :  { %s312_s19 = smov [#allocation9]   ;;  %100 = vst [vmem:[%s401_s2] sm:$0xff] %v92_v45  ;;  %101 = vst [vmem:[%s401_s2 + $0x8] sm:$0xff] %v93_v46  ;;  %s257_s3 = scalar_lea.vmem %s146_s15, 256 }
  0x2c   :  { %s157_s20 = sshll.u32 %s312_s19, 4  ;;  %v98_v51 = vadd.f32 %v195_v35, %v96_v47  ;;  %v99_v52 = vadd.f32 %v196_v36, %v97_v48  ;;  %108 = vst [vmem:[#allocation8] sm:$0xff] %v106_v49  ;;  %109 = vst [vmem:[#allocation8 + $0x8] sm:$0xff] %v107_v50  ;;  %p258_p1 = scmp.ne.s32.totalorder %s146_s15, %s257_s3  ;;  %s158_s20 = int_to_ptr.vmem [resolvable:$true] %s157_s20 }
  0x2d   :  { %p262_p2 = scmp.lt.s32.totalorder %s146_s15, %s146_s15  ;;  %p263_p3 = scmp.lt.s32.totalorder %s257_s3, %s257_s3 }
  0x2e   :  { %v110_v53 = vadd.f32 %v98_v51, %v357_v2  ;;  %v111_v54 = vadd.f32 %v99_v52, %v357_v2 }
  0x2f   :  { %p264_p4 = por %p263_p3, %p262_p2 }
  0x31   :  { %p265_p5 = pnand %p264_p4, %p258_p1 }
  0x33   :  { %268 = shalt.err (!%p265_p5)
}
  0x34   :  { %151 = dma.vmem_to_hbm [thread:$0]  %s146_s15, 256, %s404_s5, [#allocation7], %s308_s9, %s308_s9, %s309_s10   ;;  %112 = vst [vmem:[#allocation9] sm:$0xff] %v110_v53  ;;  %113 = vst [vmem:[#allocation9 + $0x8] sm:$0xff] %v111_v54 }
  0x35   :  { %s277_s26 = scalar_lea.vmem %s158_s20, 256  ;;  %p282_p7 = scmp.lt.s32.totalorder %s158_s20, %s158_s20 }
  0x36   :  { %p278_p6 = scmp.ne.s32.totalorder %s158_s20, %s277_s26  ;;  %p283_p8 = scmp.lt.s32.totalorder %s277_s26, %s277_s26 }
  0x38   :  { %p284_p9 = por %p283_p8, %p282_p7 }
  0x3a   :  { %p285_p10 = pnand %p284_p9, %p278_p6 }
  0x3c   :  { %288 = shalt.err (!%p285_p10)
}
  0x3d   :  { %163 = dma.vmem_to_hbm [thread:$0]  %s158_s20, 256, %s405_s6, [#allocation10], %s308_s9, %s308_s9, %s309_s10  }
  0x3e   :  { %299 = dma.done.wait [#allocation3], 256  }
  0x3f   :  { %300 = vsyncadd [#allocation3], 4294967040 }
  0x40   :  { %301 = dma.done.wait [#allocation7], 512  }
  0x41   :  { %302 = vsyncadd [#allocation7], 4294966784 }
  0x42   :  { %303 = dma.done.wait [#allocation10], 256  }
  0x43   :  { %304 = vsyncadd [#allocation10], 4294967040 }
  0x44   :  { %178 = vsyncpa [#allocation3], 1 }
  0x45   :  { %179 = vsyncpa [#allocation7], 1 }
  0x46   :  { %180 = vsyncpa [#allocation10], 1 }
  0x47   :  { %181 = vsyncpa [#allocation4], 1 }

</bundles_post_ra>
